<compile_context>
chip_gen: v6e
topology: v6e:2x2x1
jax: 0.10.0
libtpu: 0.0.40
codegen_flags: <defaults>
</compile_context>

<pallas_src>
import functools
from typing import NamedTuple

import jax
import jax.numpy as jnp
from jax.experimental import pallas as pl
from jax.experimental.pallas import tpu as pltpu

_NEG_BIG = -1e30  # finite "-inf" for padded vocab columns (no NaN risk)


def _round_up(x, m):
    return ((x + m - 1) // m) * m


class GeneratorParams(NamedTuple):
    w_t: jax.Array    # [D, V_pad], compute dtype (bf16), padded cols are zero
    bias: jax.Array   # [1, V_pad], f32, padded cols = _NEG_BIG
    vocab: int        # original (unpadded) vocab size
    tile_v: int       # lane-dense vocab tile (multiple of 128, divides V_pad)


def prepare_params(weight, bias, *, tile_v=512, compute_dtype=jnp.bfloat16):
    """One-time conversion of torch-layout [V, D] weight + [V] bias.

    Transposes to [D, V], casts to the MXU streaming dtype, and pads the vocab
    axis up to a multiple of a lane-dense tile.  Done ONCE outside the
    per-forward hot path (no weight transpose / pad / cast per call).
    """
    w = jnp.asarray(weight)
    b = jnp.asarray(bias, jnp.float32)
    V, D = w.shape

    tn = min(tile_v, _round_up(V, 128))       # multiple of 128
    V_pad = _round_up(V, tn)                  # tn divides V_pad

    w_t = w.T.astype(compute_dtype)           # [D, V]
    if V_pad != V:
        w_t = jnp.pad(w_t, ((0, 0), (0, V_pad - V)))
        b = jnp.pad(b, (0, V_pad - V), constant_values=_NEG_BIG)
    return GeneratorParams(w_t, b.reshape(1, V_pad), V, tn)


def _generator_kernel(x_ref, w_ref, b_ref, o_ref, m_ref, l_ref,
                      *, num_v_tiles, tile_v):
    j = pl.program_id(1)

    @pl.when(j == 0)
    def _():
        m_ref[...] = jnp.full(m_ref.shape, -jnp.inf, jnp.float32)
        l_ref[...] = jnp.zeros(l_ref.shape, jnp.float32)

    # MXU matmul in bf16 (or native) input dtype with f32 accumulation.
    logits = jnp.dot(x_ref[...], w_ref[...],
                     preferred_element_type=jnp.float32)
    logits = logits + b_ref[...]              # bias already f32

    # Stash raw logits directly into the resident output block, lane-dense,
    # 128-aligned dynamic offset (no separate logits scratch).
    col = pl.multiple_of(j * tile_v, tile_v)
    o_ref[:, pl.ds(col, tile_v)] = logits.astype(o_ref.dtype)

    # Online running max / sum-exp across vocab tiles (flash-style).
    m_prev = m_ref[...]
    m_new = jnp.maximum(m_prev, jnp.max(logits, axis=-1, keepdims=True))
    l_ref[...] = (l_ref[...] * jnp.exp(m_prev - m_new)
                  + jnp.sum(jnp.exp(logits - m_new), axis=-1, keepdims=True))
    m_ref[...] = m_new

    # Finalize: in-place read-subtract-write of the resident output block.
    @pl.when(j == num_v_tiles - 1)
    def _():
        lse = m_ref[...] + jnp.log(l_ref[...])
        o_ref[...] = (o_ref[...].astype(jnp.float32) - lse).astype(o_ref.dtype)


def generator_forward(x, params: GeneratorParams, *, tile_m=None):
    """x: [B, S, D]  ->  log_softmax(x @ W^T + b): [B, S, vocab]."""
    w_t, b2, V, tn = params
    B, S, D = x.shape
    Dw, V_pad = w_t.shape
    assert Dw == D, "weight/input feature mismatch"
    assert V_pad % tn == 0
    nv = V_pad // tn
    M = B * S

    compute_dtype = w_t.dtype
    out_dtype = x.dtype
    out_b = jnp.dtype(out_dtype).itemsize
    in_b = jnp.dtype(compute_dtype).itemsize

    # Generation-aware VMEM budget (v7x: 64 MiB/TC, v5e/v6e: 128 MiB).
    try:
        vmem_cap = int(pltpu.get_tpu_info().vmem_capacity_bytes)
    except Exception:
        vmem_cap = 128 * 1024 * 1024
    vmem_budget = max(vmem_cap - 16 * 1024 * 1024, 32 * 1024 * 1024)

    # Row tile: big as possible (fills the MXU, cuts weight HBM re-reads),
    # multiple of 8, shrunk until the VMEM footprint fits the budget.
    if tile_m is None:
        tile_m = 256
    tile_m = max(8, _round_up(min(tile_m, _round_up(M, 8)), 8))

    def _footprint(tm):
        return (2 * tm * V_pad * out_b        # double-buffered resident output
                + 2 * D * tn * in_b           # double-buffered weight tile
                + 2 * tm * D * in_b           # double-buffered x tile
                + 2 * tn * 4                  # bias tile
                + 2 * tm * 4)                 # m / l scratch

    while tile_m > 8 and _footprint(tile_m) > vmem_budget:
        tile_m = max(8, _round_up(tile_m // 2, 8))

    M_pad = _round_up(M, tile_m)
    x2 = x.reshape(M, D)
    if M_pad != M:
        x2 = jnp.pad(x2, ((0, M_pad - M), (0, 0)))
    x2 = x2.astype(compute_dtype)             # bf16 into the MXU

    kernel = functools.partial(_generator_kernel, num_v_tiles=nv, tile_v=tn)

    out = pl.pallas_call(
        kernel,
        out_shape=jax.ShapeDtypeStruct((M_pad, V_pad), out_dtype),
        grid_spec=pltpu.PrefetchScalarGridSpec(
            num_scalar_prefetch=0,
            grid=(M_pad // tile_m, nv),
            in_specs=[
                pl.BlockSpec((tile_m, D), lambda i, j: (i, 0)),   # x rows
                pl.BlockSpec((D, tn), lambda i, j: (0, j)),       # weight cols
                pl.BlockSpec((1, tn), lambda i, j: (0, j)),       # bias cols
            ],
            # Output block resident across the vocab ("arbitrary") axis.
            out_specs=pl.BlockSpec((tile_m, V_pad), lambda i, j: (i, 0)),
            scratch_shapes=[
                pltpu.VMEM((tile_m, 1), jnp.float32),   # running max
                pltpu.VMEM((tile_m, 1), jnp.float32),   # running sum-exp
            ],
        ),
        compiler_params=pltpu.CompilerParams(
            dimension_semantics=("parallel", "arbitrary"),
            vmem_limit_bytes=int(vmem_budget),
        ),
    )(x2, w_t, b2)

    out = out[:M, :V]
    return out.reshape(B, S, V)


def _reference(x, weight, bias):
    # Matches the kernel's numerics: bf16-rounded operands, f32 accumulation.
    xb = x.astype(jnp.bfloat16).astype(jnp.float32)
    wb = weight.astype(jnp.bfloat16).astype(jnp.float32)
    return jax.nn.log_softmax(xb @ wb.T + bias, axis=-1)


if __name__ == "__main__":
    # --- Config 1: small, matches the module's demo sizes -------------------
    batch, seq, d_model, vocab = 2, 8, 32, 64

    key = jax.random.PRNGKey(0)
    kx, kw, kb = jax.random.split(key, 3)

    x = jax.random.normal(kx, (batch, seq, d_model), dtype=jnp.float32)
    bound = 1.0 / (d_model ** 0.5)
    weight = jax.random.uniform(kw, (vocab, d_model), jnp.float32, -bound, bound)
    bias = jax.random.uniform(kb, (vocab,), jnp.float32, -bound, bound)

    params = prepare_params(weight, bias)     # one-time transpose/pad/cast
    out = generator_forward(x, params)
    jax.block_until_ready(out)

    ref = _reference(x, weight, bias)
    assert out.shape == (batch, seq, vocab)
    assert jnp.allclose(out, ref, atol=1e-4, rtol=1e-4), \
        float(jnp.max(jnp.abs(out - ref)))

    # --- Config 2: ragged vocab (pad path), M padding, multiple vocab tiles -
    b2_, s2_, d2_, v2_ = 2, 130, 64, 1000     # M=260 (padded), V=1000 -> pad to 1024
    k2 = jax.random.PRNGKey(1)
    k2x, k2w, k2b = jax.random.split(k2, 3)
    x2 = jax.random.normal(k2x, (b2_, s2_, d2_), dtype=jnp.float32)
    bound2 = 1.0 / (d2_ ** 0.5)
    w2 = jax.random.uniform(k2w, (v2_, d2_), jnp.float32, -bound2, bound2)
    bb2 = jax.random.uniform(k2b, (v2_,), jnp.float32, -bound2, bound2)

    out2 = generator_forward(x2, prepare_params(w2, bb2))
    jax.block_until_ready(out2)
    ref2 = _reference(x2, w2, bb2)
    assert out2.shape == (b2_, s2_, v2_)
    assert jnp.allclose(out2, ref2, atol=1e-4, rtol=1e-4), \
        float(jnp.max(jnp.abs(out2 - ref2)))

    print("KERNEL_OK")
</pallas_src>

<mosaic_0001>
module attributes {stable_mosaic.version = 11 : i64} {
  func.func @_generator_kernel(%arg0: i32, %arg1: i32, %arg2: memref<16x32xbf16, #tpu.memory_space<vmem>>, %arg3: memref<32x128xbf16, #tpu.memory_space<vmem>>, %arg4: memref<1x128xf32, #tpu.memory_space<vmem>>, %arg5: memref<16x128xf32, #tpu.memory_space<vmem>>, %arg6: memref<16x1xf32, #tpu.memory_space<vmem>>, %arg7: memref<16x1xf32, #tpu.memory_space<vmem>>) attributes {dimension_semantics = [#tpu.dimension_semantics<parallel>, #tpu.dimension_semantics<arbitrary>], iteration_bounds = array<i64: 1, 1>, scalar_prefetch = 0 : i64, scratch_operands = 2 : i64, tpu.core_type = #tpu.core_type<tc>, window_params = [{transform_indices = @transform_0, window_bounds = array<i64: 16, 32>}, {transform_indices = @transform_1, window_bounds = array<i64: 32, 128>}, {transform_indices = @transform_2, window_bounds = array<i64: 1, 128>}, {transform_indices = @transform_3, window_bounds = array<i64: 16, 128>}]} {
    %c0_i32 = arith.constant 0 : i32
    %0 = arith.cmpi eq, %arg1, %c0_i32 : i32
    %1 = arith.extui %0 : i1 to i32
    %c0_i32_0 = arith.constant 0 : i32
    %2 = arith.cmpi ne, %1, %c0_i32_0 : i32
    scf.if %2 {
      %cst_19 = arith.constant 0xFF800000 : f32
      %32 = vector.broadcast %cst_19 : f32 to vector<16x1xf32>
      %c0_20 = arith.constant 0 : index
      %c0_21 = arith.constant 0 : index
      %33 = vector.load %arg6[%c0_20, %c0_21] : memref<16x1xf32, #tpu.memory_space<vmem>>, vector<16x1xf32>
      tpu.vector_store %arg6[%c0_20, %c0_21], %32 {strides = array<i32>} : memref<16x1xf32, #tpu.memory_space<vmem>>, vector<16x1xf32>,
      %cst_22 = arith.constant 0.000000e+00 : f32
      %34 = vector.broadcast %cst_22 : f32 to vector<16x1xf32>
      %c0_23 = arith.constant 0 : index
      %c0_24 = arith.constant 0 : index
      %35 = vector.load %arg7[%c0_23, %c0_24] : memref<16x1xf32, #tpu.memory_space<vmem>>, vector<16x1xf32>
      tpu.vector_store %arg7[%c0_23, %c0_24], %34 {strides = array<i32>} : memref<16x1xf32, #tpu.memory_space<vmem>>, vector<16x1xf32>,
    } else {
    }
    %c0 = arith.constant 0 : index
    %c0_1 = arith.constant 0 : index
    %3 = vector.load %arg2[%c0, %c0_1] : memref<16x32xbf16, #tpu.memory_space<vmem>>, vector<16x32xbf16>
    %c0_2 = arith.constant 0 : index
    %c0_3 = arith.constant 0 : index
    %4 = vector.load %arg3[%c0_2, %c0_3] : memref<32x128xbf16, #tpu.memory_space<vmem>>, vector<32x128xbf16>
    %cst = arith.constant dense<0.000000e+00> : vector<16x128xf32>
    %5 = tpu.matmul %3, %4, %cst {dimension_numbers = #tpu.dot_dimension_numbers<[1], [0], [0], [1], [0, 0, 1, 1], [], []>} : vector<16x32xbf16>, vector<32x128xbf16>, vector<16x128xf32> -> vector<16x128xf32>
    %c0_4 = arith.constant 0 : index
    %c0_5 = arith.constant 0 : index
    %6 = vector.load %arg4[%c0_4, %c0_5] : memref<1x128xf32, #tpu.memory_space<vmem>>, vector<1x128xf32>
    %7 = vector.broadcast %6 : vector<1x128xf32> to vector<16x128xf32>
    %8 = arith.addf %5, %7 : vector<16x128xf32>
    %c128_i32 = arith.constant 128 : i32
    %9 = arith.muli %arg1, %c128_i32 : i32
    %10 = tpu.assume_multiple %9, 128 : i32
    %c0_6 = arith.constant 0 : index
    %11 = arith.index_cast %10 : i32 to index
    %12 = vector.load %arg5[%c0_6, %11] : memref<16x128xf32, #tpu.memory_space<vmem>>, vector<16x128xf32>
    tpu.vector_store %arg5[%c0_6, %11], %8 {strides = array<i32>} : memref<16x128xf32, #tpu.memory_space<vmem>>, vector<16x128xf32>,
    %c0_7 = arith.constant 0 : index
    %c0_8 = arith.constant 0 : index
    %13 = vector.load %arg6[%c0_7, %c0_8] : memref<16x1xf32, #tpu.memory_space<vmem>>, vector<16x1xf32>
    %cst_9 = arith.constant dense<0xFF800000> : vector<16xf32>
    %14 = vector.multi_reduction <maximumf>, %8, %cst_9 [1] : vector<16x128xf32> to vector<16xf32>
    %15 = vector.shape_cast %14 : vector<16xf32> to vector<16x1xf32>
    %16 = arith.maximumf %13, %15 : vector<16x1xf32>
    %c0_10 = arith.constant 0 : index
    %c0_11 = arith.constant 0 : index
    %17 = vector.load %arg7[%c0_10, %c0_11] : memref<16x1xf32, #tpu.memory_space<vmem>>, vector<16x1xf32>
    %18 = arith.subf %13, %16 : vector<16x1xf32>
    %19 = math.exp %18 : vector<16x1xf32>
    %20 = arith.mulf %17, %19 : vector<16x1xf32>
    %21 = vector.broadcast %16 : vector<16x1xf32> to vector<16x128xf32>
    %22 = arith.subf %8, %21 : vector<16x128xf32>
    %23 = math.exp %22 : vector<16x128xf32>
    %cst_12 = arith.constant dense<0.000000e+00> : vector<16xf32>
    %24 = vector.multi_reduction <add>, %23, %cst_12 [1] : vector<16x128xf32> to vector<16xf32>
    %25 = vector.shape_cast %24 : vector<16xf32> to vector<16x1xf32>
    %26 = arith.addf %20, %25 : vector<16x1xf32>
    %c0_13 = arith.constant 0 : index
    %c0_14 = arith.constant 0 : index
    %27 = vector.load %arg7[%c0_13, %c0_14] : memref<16x1xf32, #tpu.memory_space<vmem>>, vector<16x1xf32>
    tpu.vector_store %arg7[%c0_13, %c0_14], %26 {strides = array<i32>} : memref<16x1xf32, #tpu.memory_space<vmem>>, vector<16x1xf32>,
    %c0_15 = arith.constant 0 : index
    %c0_16 = arith.constant 0 : index
    %28 = vector.load %arg6[%c0_15, %c0_16] : memref<16x1xf32, #tpu.memory_space<vmem>>, vector<16x1xf32>
    tpu.vector_store %arg6[%c0_15, %c0_16], %16 {strides = array<i32>} : memref<16x1xf32, #tpu.memory_space<vmem>>, vector<16x1xf32>,
    %c0_i32_17 = arith.constant 0 : i32
    %29 = arith.cmpi eq, %arg1, %c0_i32_17 : i32
    %30 = arith.extui %29 : i1 to i32
    %c0_i32_18 = arith.constant 0 : i32
    %31 = arith.cmpi ne, %30, %c0_i32_18 : i32
    scf.if %31 {
      %c0_19 = arith.constant 0 : index
      %c0_20 = arith.constant 0 : index
      %32 = vector.load %arg6[%c0_19, %c0_20] : memref<16x1xf32, #tpu.memory_space<vmem>>, vector<16x1xf32>
      %c0_21 = arith.constant 0 : index
      %c0_22 = arith.constant 0 : index
      %33 = vector.load %arg7[%c0_21, %c0_22] : memref<16x1xf32, #tpu.memory_space<vmem>>, vector<16x1xf32>
      %34 = math.log %33 : vector<16x1xf32>
      %35 = arith.addf %32, %34 : vector<16x1xf32>
      %c0_23 = arith.constant 0 : index
      %c0_24 = arith.constant 0 : index
      %36 = vector.load %arg5[%c0_23, %c0_24] : memref<16x128xf32, #tpu.memory_space<vmem>>, vector<16x128xf32>
      %37 = vector.broadcast %35 : vector<16x1xf32> to vector<16x128xf32>
      %38 = arith.subf %36, %37 : vector<16x128xf32>
      %c0_25 = arith.constant 0 : index
      %c0_26 = arith.constant 0 : index
      %39 = vector.load %arg5[%c0_25, %c0_26] : memref<16x128xf32, #tpu.memory_space<vmem>>, vector<16x128xf32>
      tpu.vector_store %arg5[%c0_25, %c0_26], %38 {strides = array<i32>} : memref<16x128xf32, #tpu.memory_space<vmem>>, vector<16x128xf32>,
    } else {
    }
    return
  }
  func.func @transform_0(%arg0: i32, %arg1: i32) -> (i32, i32) {
    %c0_i32 = arith.constant 0 : i32
    %c0_i32_0 = arith.constant 0 : i32
    return %arg0, %c0_i32 : i32, i32
  }
  func.func @transform_1(%arg0: i32, %arg1: i32) -> (i32, i32) {
    %c0_i32 = arith.constant 0 : i32
    %c0_i32_0 = arith.constant 0 : i32
    return %c0_i32, %arg1 : i32, i32
  }
  func.func @transform_2(%arg0: i32, %arg1: i32) -> (i32, i32) {
    %c0_i32 = arith.constant 0 : i32
    %c0_i32_0 = arith.constant 0 : i32
    return %c0_i32, %arg1 : i32, i32
  }
  func.func @transform_3(%arg0: i32, %arg1: i32) -> (i32, i32) {
    %c0_i32 = arith.constant 0 : i32
    %c0_i32_0 = arith.constant 0 : i32
    return %arg0, %c0_i32 : i32, i32
  }
}

</mosaic_0001>

<bundles_post_ra>
// kernel: tpu_custom_call.1
= control target key start
LH: loop header
LB: loop body
LE: loop exit
PB: predicated region body
PF: predicated region fallthrough
CT: control target
= control target key end

     0   :  { %8 = vsyncpa [#allocation5], 0  ;;  %s398_s0 = inlined_call_operand.hbm [shape: bf16[16,32], index: 0, kind: input, shape index: {}]   ;;  %s399_s1 = inlined_call_operand.hbm [shape: bf16[32,128], index: 1, kind: input, shape index: {}]   ;;  %s400_s2 = inlined_call_operand.vmem [shape: f32[1,128], index: 2, kind: input, shape index: {}]   ;;  %s401_s3 = inlined_call_operand.hbm [shape: f32[16,128], index: 3, kind: output, shape index: {}]  }
   0x1   :  { %9 = vsyncpa [#allocation8], 0 }
   0x2   :  { %10 = vsyncpa [#allocation6], 0  ;;  %s337_s12 = smov [#allocation4]  }
   0x3   :  { %s16_s13 = sshll.u32 %s337_s12, 4  ;;  %s17_s13 = int_to_ptr.vmem [resolvable:$true] %s16_s13 }
   0x4   :  { %s279_s14 = scalar_lea.vmem %s17_s13, 128  ;;  %p284_p1 = scmp.lt.s32.totalorder %s17_s13, %s17_s13 }
   0x5   :  { %p280_p0 = scmp.ne.s32.totalorder %s17_s13, %s279_s14  ;;  %p285_p2 = scmp.lt.s32.totalorder %s279_s14, %s279_s14 }
   0x7   :  { %p286_p3 = por %p285_p2, %p284_p1 }
   0x9   :  { %p287_p4 = pnand %p286_p3, %p280_p0 }
   0xb   :  { %290 = shalt.err (!%p287_p4)
}
   0xc   :  { %s338_s15 = smov 64   ;;  %s339_s16 = smov 4  }
   0xd   :  { %22 = dma.hbm_to_vmem [thread:$0]  %s398_s0, 128, %s17_s13, [#allocation5], %s338_s15, %s338_s15, %s339_s16  }
   0xe   :  { %s340_s19 = smov [#allocation7]  }
   0xf   :  { %s28_s20 = sshll.u32 %s340_s19, 4  ;;  %s29_s20 = int_to_ptr.vmem [resolvable:$true] %s28_s20 }
  0x10   :  { %s299_s21 = scalar_lea.vmem %s29_s20, 256  ;;  %p304_p6 = scmp.lt.s32.totalorder %s29_s20, %s29_s20 }
  0x11   :  { %p300_p5 = scmp.ne.s32.totalorder %s29_s20, %s299_s21  ;;  %p305_p7 = scmp.lt.s32.totalorder %s299_s21, %s299_s21 }
  0x13   :  { %p306_p8 = por %p305_p7, %p304_p6 }
  0x15   :  { %p307_p9 = pnand %p306_p8, %p300_p5 }
  0x17   :  { %310 = shalt.err (!%p307_p9)
}
  0x18   :  { %34 = dma.hbm_to_vmem [thread:$0]  %s399_s1, 256, %s29_s20, [#allocation8], %s338_s15, %s338_s15, %s339_s16  }
  0x19   :  { %331 = dma.done.wait [#allocation5], 128  }
  0x1a   :  { %332 = vsyncadd [#allocation5], 4294967168 }
  0x1b   :  { %333 = dma.done.wait [#allocation8], 256  }
  0x1c   :  { %334 = vsyncadd [#allocation8], 4294967040  ;;  %vm48_vm0 = vcmask 7168   ;;  %v341_v0 = vmov 0.0   ;;  %vm342_vm1 = vmmov 0   ;;  %v256_v1 = vld [vmem:[#allocation7 + $0x8] sm:$0xff]  }
  0x1d   :  { %51 = vst.msk [vmem:[#allocation3] sm:$0xff] %vm48_vm0, %v341_v0  ;;  %52 = vst.msk [vmem:[#allocation3 + $0x8] sm:$0xff] %vm48_vm0, %v341_v0  ;;  %235 = vmatprep.subr.bf16.mxu0 %v341_v0  ;;  %239 = vmatprep.mubr.msk.bf16.mxu0 %vm342_vm1, %v341_v0  ;;  %v257_v2 = vld [vmem:[#allocation7] sm:$0xff]   ;;  %v258_v3 = vld [vmem:[#allocation4] sm:$0xff]   ;;  %vm83_vm2 = vcmask 261120   ;;  %v343_v4 = vmov -inf  }
  0x1e   :  { %236 = vmatpush3.bf16.msra.mxu0 %v256_v1  ;;  %49 = vst.msk [vmem:[#allocation2] sm:$0xff] %vm48_vm0, %v343_v4  ;;  %50 = vst.msk [vmem:[#allocation2 + $0x8] sm:$0xff] %vm48_vm0, %v343_v4  ;;  %v227_v5 = vld [vmem:[%s400_s2] ss:$0 sm:$0xff]  ;;  %v344_v12 = vmov 0   ;;  %s345_s2 = smov [#allocation9]  }
  0x1f   :  { %237 = vmatprep.subr.bf16.mxu0 %v341_v0  ;;  %254 = vset.pattern.permute.xlu1 %v344_v12  ;;  %s213_s24 = sshll.u32 %s345_s2, 4  ;;  %s214_s24 = int_to_ptr.vmem [resolvable:$true] %s213_s24 }
  0x20   :  { %255 = vset.pattern.permute.xlu0 %v344_v12  ;;  %s311_s25 = scalar_lea.vmem %s214_s24, 256  ;;  %p316_p11 = scmp.lt.s32.totalorder %s214_s24, %s214_s24 }
  0x21   :  { %p312_p10 = scmp.ne.s32.totalorder %s214_s24, %s311_s25  ;;  %p317_p12 = scmp.lt.s32.totalorder %s311_s25, %s311_s25 }
  0x22   :  { %238 = vmatpush3.bf16.msra.mxu0 %v257_v2 }
  0x23   :  { %p318_p13 = por %p317_p12, %p316_p11 }
  0x24   :  { %v142_v32 = vld [vmem:[#allocation3] sm:$0xff]  ;;  %v143_v36 = vld [vmem:[#allocation3 + $0x8] sm:$0xff] }
  0x25   :  { %240 = vmatmul.mubr.msk.bf16.vlgmr.msra.gmra.mxu0 %vm83_vm2, %v258_v3  ;;  %v134_v13 = vld [vmem:[#allocation2] sm:$0xff]  ;;  %v135_v16 = vld [vmem:[#allocation2 + $0x8] sm:$0xff]  ;;  %p319_p0 = pnand %p318_p13, %p312_p10 }
  0xe5   :  { %v121_v6 = vpop.f32.mrf.mxu0 }
  0xe6   :  { %v381_v7 = vadd.f32 %v227_v5, %v121_v6 }
  0xe7   :  { %v241_v8 = vpop.f32.mrf.mxu0 }
  0xe8   :  { %136 = vmax.xlane.f32.xlu0 %v381_v7 }
  0xe9   :  { %v124_v9 = vpop.f32.mrf.mxu0 }
  0xea   :  { %v384_v10 = vadd.f32 %v227_v5, %v124_v9 }
  0xeb   :  { %v242_v11 = vpop.f32.mrf.mxu0 }
  0xec   :  { %138 = vmax.xlane.f32.xlu0 %v384_v10 }
 0x171   :  { %v137_v14 = vpop.xlane.xlu0 %136 }
 0x172   :  { %v140_v15 = vmax.f32 %v134_v13, %v137_v14 }
 0x174   :  { %v144_v17 = vsub.f32 %v134_v13, %v140_v15  ;;  %177 = vst.msk [vmem:[#allocation2] sm:$0xff] %vm48_vm0, %v140_v15  ;;  %154 = vperm.xlu1 %254, %v140_v15  }
 0x175   :  { %v139_v18 = vpop.xlane.xlu0 %138 }
 0x176   :  { %v141_v19 = vmax.f32 %v135_v16, %v139_v18  ;;  %v146_v29 = vmul.f32 1.442695, %v144_v17 }
 0x178   :  { %v145_v20 = vsub.f32 %v135_v16, %v141_v19  ;;  %178 = vst.msk [vmem:[#allocation2 + $0x8] sm:$0xff] %vm48_vm0, %v141_v19  ;;  %159 = vperm.xlu1 %254, %v141_v19  }
 0x17a   :  { %v148_v30 = vmul.f32 1.442695, %v145_v20 }
 0x17b   :  { %v182_v45 = vld [vmem:[#allocation2] sm:$0xff] }
 0x17f   :  { %v183_v49 = vld [vmem:[#allocation2 + $0x8] sm:$0xff] }
 0x1ef   :  { %v155_v21 = vpop.permute.xlu1 %154 }
 0x1f0   :  { %v162_v22 = vsub.f32 %v381_v7, %v155_v21 }
 0x1f2   :  { %v164_v23 = vmul.f32 1.442695, %v162_v22 }
 0x1f3   :  { %v160_v24 = vpop.permute.xlu1 %159 }
 0x1f4   :  { %259 = vpow2.f32 %v164_v23  ;;  %v163_v25 = vsub.f32 %v384_v10, %v160_v24 }
 0x1f6   :  { %v166_v26 = vmul.f32 1.442695, %v163_v25 }
 0x1f8   :  { %261 = vpow2.f32 %v166_v26 }
 0x1f9   :  { %263 = vpow2.f32 %v146_v29 }
 0x1fa   :  { %265 = vpow2.f32 %v148_v30 }
 0x201   :  { %v260_v27 = vpop.eup %259 }
 0x202   :  { %168 = vadd.xlane.f32.xlu0 %v260_v27 }
 0x205   :  { %v262_v28 = vpop.eup %261 }
 0x206   :  { %170 = vadd.xlane.f32.xlu1 %v262_v28  ;;  %v264_v31 = vpop.eup %263 }
 0x207   :  { %v150_v33 = vmul.f32 %v264_v31, %v142_v32  ;;  %v266_v34 = vpop.eup %265 }
 0x208   :  { %v151_v38 = vmul.f32 %v266_v34, %v143_v36 }
 0x28b   :  { %v169_v35 = vpop.xlane.xlu0 %168 }
 0x28c   :  { %v172_v37 = vadd.f32 %v169_v35, %v150_v33 }
 0x28e   :  { %175 = vst.msk [vmem:[#allocation3] sm:$0xff] %vm48_vm0, %v172_v37 }
 0x28f   :  { %v171_v39 = vpop.xlane.xlu1 %170 }
 0x290   :  { %v173_v40 = vadd.f32 %v171_v39, %v151_v38 }
 0x292   :  { %176 = vst.msk [vmem:[#allocation3 + $0x8] sm:$0xff] %vm48_vm0, %v173_v40 }
 0x295   :  { %v184_v41 = vld [vmem:[#allocation3] sm:$0xff] }
 0x296   :  { %267 = vlog2.f32 %v184_v41 }
 0x299   :  { %v185_v42 = vld [vmem:[#allocation3 + $0x8] sm:$0xff] }
 0x29a   :  { %269 = vlog2.f32 %v185_v42 }
 0x2a3   :  { %v268_v43 = vpop.eup %267 }
 0x2a4   :  { %v187_v44 = vmul.f32 0.6931472, %v268_v43 }
 0x2a6   :  { %v190_v46 = vadd.f32 %v187_v44, %v182_v45 }
 0x2a7   :  { %v270_v47 = vpop.eup %269 }
 0x2a8   :  { %196 = vperm.xlu0 %255, %v190_v46   ;;  %v189_v48 = vmul.f32 0.6931472, %v270_v47 }
 0x2aa   :  { %v191_v50 = vadd.f32 %v189_v48, %v183_v49 }
 0x2ac   :  { %201 = vperm.xlu1 %254, %v191_v50  }
 0x323   :  { %v197_v51 = vpop.permute.xlu0 %196 }
 0x324   :  { %v204_v52 = vsub.f32 %v381_v7, %v197_v51 }
 0x326   :  { %206 = vst [vmem:[#allocation9] sm:$0xff] %v204_v52 }
 0x327   :  { %v202_v53 = vpop.permute.xlu1 %201 }
 0x328   :  { %v205_v54 = vsub.f32 %v384_v10, %v202_v53 }
 0x32a   :  { %207 = vst [vmem:[#allocation9 + $0x8] sm:$0xff] %v205_v54 }
 0x32b   :  { %322 = shalt.err (!%p319_p0)
}
 0x32c   :  { %s346_s26 = smov 128   ;;  %s347_s27 = smov 8  }
 0x32d   :  { %219 = dma.vmem_to_hbm [thread:$0]  %s214_s24, 256, %s401_s3, [#allocation6], %s346_s26, %s346_s26, %s347_s27  }
 0x32e   :  { %335 = dma.done.wait [#allocation6], 256  }
 0x32f   :  { %336 = vsyncadd [#allocation6], 4294967040 }
 0x330   :  { %223 = vsyncpa [#allocation5], 1 }
 0x331   :  { %224 = vsyncpa [#allocation8], 1 }
 0x332   :  { %225 = vsyncpa [#allocation6], 1 }

</bundles_post_ra>
